<compile_context>
chip_gen: v5e
topology: v5e:2x2
jax: 0.10.0
libtpu: 0.0.40
codegen_flags: <defaults>
</compile_context>

<pallas_src>
import functools

import numpy as np
import jax
import jax.numpy as jnp
from jax import lax
from jax.experimental import pallas as pl
from jax.experimental.pallas import tpu as pltpu


def _vmem_spec():
    return pl.BlockSpec(memory_space=pltpu.MemorySpace.VMEM)


@functools.lru_cache(maxsize=None)
def _mmd_signed_mask(batch):
    """Static signed selection mask reproducing the mmd_rbf_accelerate index loop:
    loss = sum_i K[s1,s2] + K[t1,t2] - K[s1,t2] - K[s2,t1],  s2 = (i+1) % batch."""
    n2 = 2 * batch
    m = np.zeros((n2, n2), np.float32)
    for i in range(batch):
        s1, s2 = i, (i + 1) % batch
        t1, t2 = s1 + batch, s2 + batch
        m[s1, s2] += 1.0
        m[t1, t2] += 1.0
        m[s1, t2] -= 1.0
        m[s2, t1] -= 1.0
    return m


# ---------------------------------------------------------------------------
# Fused forward kernel.
#
# Inputs (all whole-array VMEM; shapes are tiny so no grid is needed):
#   src_ref  : (B, in_dim)   f32  -- flattened source batch
#   tgt_ref  : (B, in_dim)   f32  -- flattened target batch
#   wf_ref   : (in_dim, 64)  bf16 -- synthetic CFE weight (pre-cast param)
#   bf_ref   : (1, 64)       f32
#   w1_ref   : (64, 32)      f32  -- classifier Linear(64, width)
#   b1_ref   : (1, 32)       f32
#   w2_ref   : (32, 3)       f32  -- classifier Linear(width, 3)
#   b2_ref   : (1, 3)        f32
#   mask_ref : (2B, 2B)      f32  -- static signed MMD selection mask
# Output:
#   o_ref    : (B, 128)      f32 lane-dense packed slab:
#       [:, 0:B]          sim_matrix_target
#       [:, B:2B]         estimated_sim_truth_target
#       [:, 2B:2B+3]      source_clf (logits)
#       [:, 2B+3:2B+6]    softmax(target logits)
#       [:, 2B+6]         transfer_loss (broadcast down the column)
# ---------------------------------------------------------------------------
def _fused_forward_kernel(src_ref, tgt_ref, wf_ref, bf_ref, w1_ref, b1_ref,
                          w2_ref, b2_ref, mask_ref, o_ref):
    B = src_ref.shape[0]
    n2 = 2 * B
    F = wf_ref.shape[1]          # 64

    # ---- Feature extractor (synthetic CFE): relu(x @ Wf + bf).
    # Cast activations to bf16 at the MXU operand boundary only (f32 accumulation).
    wf = wf_ref[...]                                                      # bf16
    feat_s = jnp.dot(src_ref[...].astype(jnp.bfloat16), wf,
                     preferred_element_type=jnp.float32)                  # (B, 64) f32
    feat_t = jnp.dot(tgt_ref[...].astype(jnp.bfloat16), wf,
                     preferred_element_type=jnp.float32)                  # (B, 64) f32
    feat = jnp.concatenate([feat_s, feat_t], axis=0)                      # (2B, 64)
    feat = jnp.maximum(feat + bf_ref[...], 0.0)                           # f32 (VPU math stays f32: v5e)

    feat_bf = feat.astype(jnp.bfloat16)                                   # MXU operand copy

    # ---- Classifier: Linear(64,32) -> ReLU -> Dropout(eval = id) -> Linear(32,3)
    w1 = w1_ref[...].astype(jnp.bfloat16)
    w2 = w2_ref[...].astype(jnp.bfloat16)
    h = jnp.dot(feat_bf, w1, preferred_element_type=jnp.float32) + b1_ref[...]
    h = jnp.maximum(h, 0.0)
    logits = (jnp.dot(h.astype(jnp.bfloat16), w2,
                      preferred_element_type=jnp.float32) + b2_ref[...])  # (2B, 3)

    src_clf = logits[:B, :]                                               # (B, 3)
    tgt_logits = logits[B:, :]                                            # (B, 3)

    # ---- softmax(target logits)  (exp + recip on EUP slot)
    mx = jnp.max(tgt_logits, axis=1, keepdims=True)
    ex = jnp.exp(tgt_logits - mx)
    probs = ex * pl.reciprocal(jnp.sum(ex, axis=1, keepdims=True), approx=True)

    # ---- cosine-similarity of softmax rows + threshold (> 0.9)
    inv_norm = lax.rsqrt(jnp.sum(probs * probs, axis=1, keepdims=True) + 1e-12)
    pn_bf = (probs * inv_norm).astype(jnp.bfloat16)
    sim = lax.dot_general(pn_bf, pn_bf, dimension_numbers=(((1,), (1,)), ((), ())),
                          preferred_element_type=jnp.float32)             # (B, B)
    est = jnp.where(sim > 0.9, 1.0, 0.0)

    # ---- mmd_rbf_accelerate(source_feat, target_feat), total = feat (VMEM-resident)
    featsq = feat * feat
    sq_col = jnp.sum(featsq, axis=1, keepdims=True)                       # (2B, 1): ||x_i||^2
    ones_row = jnp.ones((1, F), jnp.float32)
    sq_row = lax.dot_general(ones_row, featsq,                            # (1, 2B): ||x_j||^2
                             dimension_numbers=(((1,), (1,)), ((), ())),
                             preferred_element_type=jnp.float32)
    gram = lax.dot_general(feat_bf, feat_bf,                              # bf16 operands, f32 acc
                           dimension_numbers=(((1,), (1,)), ((), ())),
                           preferred_element_type=jnp.float32)            # (2B, 2B)
    # Clamp: bf16 rounding can push pairwise sq-dists slightly negative.
    l2 = jnp.maximum(sq_col + sq_row - 2.0 * gram, 0.0)

    # bandwidth = sum(L2) / (n^2 - n); then /= kernel_mul ** (kernel_num // 2)
    bw = jnp.sum(l2, keepdims=True) / float(n2 * n2 - n2)                 # (1, 1)
    bw = jnp.maximum(bw, 1e-8)            # floor: avoid exp(-x/0) for identical dists
    bw = bw * (1.0 / (2.0 ** (5 // 2)))   # kernel_mul = 2.0, kernel_num = 5
    neg_inv_bw = -pl.reciprocal(bw, approx=True)                          # (1, 1)

    # kernel_val[i] = exp(-l2 / (bw * 2^i)) = exp(l2 * neg_inv_bw * 0.5^i)
    kval = jnp.zeros_like(l2)
    for i in range(5):
        kval = kval + jnp.exp(l2 * (neg_inv_bw * (0.5 ** i)))

    transfer_loss = jnp.sum(kval * mask_ref[...]) * (1.0 / float(B))      # scalar

    # ---- lane-dense packed output slab: single unmasked (B, 128) store.
    pad = 128 - (2 * B + 7)
    loss_col = jnp.zeros((B, 1), jnp.float32) + transfer_loss
    slab = jnp.concatenate(
        [sim, est, src_clf, probs, loss_col, jnp.zeros((B, pad), jnp.float32)],
        axis=1)                                                           # (B, 128)
    o_ref[...] = slab


def fused_forward(src_flat, tgt_flat, wf_bf16, bf, w1, b1, w2, b2, signed_mask):
    B, in_dim = src_flat.shape
    n2 = 2 * B
    assert 2 * B + 7 <= 128, "packed output slab requires 2B+7 <= 128 lanes"
    F = wf_bf16.shape[1]
    width = w1.shape[1]
    ncls = w2.shape[1]

    flops = (2 * n2 * in_dim * F                 # feature matmuls
             + 2 * n2 * F * n2                   # gram
             + 2 * n2 * F * width + 2 * n2 * width * ncls   # classifier
             + 2 * B * ncls * B)                 # cosine-sim
    transcendentals = 5 * n2 * n2 + B * ncls
    bytes_accessed = (n2 * in_dim * 4 + in_dim * F * 2
                      + (F * width + width * ncls + F + width + ncls) * 4
                      + n2 * n2 * 4 + B * 128 * 4)

    return pl.pallas_call(
        _fused_forward_kernel,
        out_shape=jax.ShapeDtypeStruct((B, 128), jnp.float32),
        in_specs=[_vmem_spec()] * 9,
        out_specs=_vmem_spec(),
        cost_estimate=pl.CostEstimate(flops=flops,
                                      transcendentals=transcendentals,
                                      bytes_accessed=bytes_accessed),
        # TODO(synk): for the real CFE in_dim / production batch sizes, switch to a
        # K-tiled grid ("arbitrary" axis, f32 VMEM accumulator under pl.when(k==0))
        # plus a "parallel" batch axis so v7x's second TensorCore is used, with tile
        # sizes budgeted for v7x's 64 MiB VMEM (set vmem_limit_bytes explicitly).
    )(src_flat, tgt_flat, wf_bf16, bf, w1, b1, w2, b2, signed_mask)


# ---------------------------------------------------------------------------
# Transfer_Net parameters + forward wrapper
# ---------------------------------------------------------------------------
def init_params(key, in_dim, num_class=3, width=32):
    k = jax.random.split(key, 6)
    scale = 0.05
    params = {
        # synthetic CFE backbone (Linear in_dim -> 64, ReLU); weight pre-cast to bf16
        # so the kernel's feature matmul takes the fast MXU path with no wrapper cast.
        "Wf": (scale * jax.random.normal(k[0], (in_dim, 64), jnp.float32)
               ).astype(jnp.bfloat16),
        "bf": scale * jax.random.normal(k[1], (1, 64), jnp.float32),
        # classifier: Linear(64, width) -> ReLU -> Dropout(eval) -> Linear(width, 3)
        "W1": scale * jax.random.normal(k[2], (64, width), jnp.float32),
        "b1": scale * jax.random.normal(k[3], (1, width), jnp.float32),
        "W2": scale * jax.random.normal(k[4], (width, 3), jnp.float32),
        "b2": scale * jax.random.normal(k[5], (1, 3), jnp.float32),
        # self.P = torch.randn(num_class, 64): unused in forward, kept for shape fidelity
        "P": jax.random.normal(jax.random.PRNGKey(123), (num_class, 64), jnp.float32),
    }
    return params


@jax.jit
def transfer_net_forward(params, source, target, s_label,
                         confidence_threshold=0.65):
    B = source.shape[0]
    # NCHW -> (B, C*H*W), row-major like torch.view; reshape is free, stays f32.
    src_flat = source.reshape(B, -1)
    tgt_flat = target.reshape(B, -1)

    # Static signed MMD selection mask (built once per B at trace time).
    signed_mask = _mmd_signed_mask(B)

    packed = fused_forward(src_flat, tgt_flat, params["Wf"], params["bf"],
                           params["W1"], params["b1"],
                           params["W2"], params["b2"], signed_mask)      # (B, 128)

    sim_matrix_target = packed[:, 0:B]                          # (B, B)
    estimated_sim_truth_target = packed[:, B:2 * B]             # (B, B)
    source_clf = packed[:, 2 * B:2 * B + 3]                     # (B, 3) logits
    target_clf = packed[:, 2 * B + 3:2 * B + 6]                 # (B, 3) softmax probs
    transfer_loss = packed[0, 2 * B + 6]                        # scalar (MMD-RBF)

    # pseudo-label / confidence-mask bookkeeping (tiny glue, kept for fidelity)
    target_probabilities = jnp.max(target_clf, axis=1)
    confidence_mask = target_probabilities > confidence_threshold
    pseudo_labels_all = jnp.argmax(target_clf, axis=1)
    s_label_idx = jnp.argmax(s_label, axis=1)

    # TODO(synk): cmmd_1.cmmd source is unavailable and requires dynamic-shape boolean
    # masking (confident_target_data = target_data[confidence_mask]); returning 0.0
    # placeholder while exposing confidence_mask / pseudo_labels for a future impl.
    cmmd_loss = jnp.zeros((), jnp.float32)
    del pseudo_labels_all, s_label_idx, confidence_mask  # computed for fidelity; unused here

    return (source_clf, transfer_loss, cmmd_loss,
            sim_matrix_target, estimated_sim_truth_target)


if __name__ == "__main__":
    # Small shapes consistent with the module: NCHW inputs, 3-class labels.
    B, C, H, W = 8, 4, 16, 16
    num_class = 3

    key = jax.random.PRNGKey(0)
    k_src, k_tgt, k_lab, k_par = jax.random.split(key, 4)

    source = jax.random.normal(k_src, (B, C, H, W), jnp.float32)
    target = jax.random.normal(k_tgt, (B, C, H, W), jnp.float32)
    s_label = jax.nn.one_hot(
        jax.random.randint(k_lab, (B,), 0, num_class), num_class, dtype=jnp.float32)
    e = 0  # epoch-style argument in the original forward; unused by the computation

    params = init_params(k_par, in_dim=C * H * W, num_class=num_class, width=32)

    outs = transfer_net_forward(params, source, target, s_label)
    outs = jax.block_until_ready(outs)

    source_clf, transfer_loss, cmmd_loss, sim_m, est_sim = outs
    assert source_clf.shape == (B, 3)
    assert sim_m.shape == (B, B) and est_sim.shape == (B, B)
    assert transfer_loss.shape == () and cmmd_loss.shape == ()
    assert bool(jnp.all(jnp.isfinite(source_clf)))
    assert bool(jnp.isfinite(transfer_loss))
    print("KERNEL_OK")
</pallas_src>

<mosaic_0001>
module attributes {stable_mosaic.version = 11 : i64} {
  func.func @_fused_forward_kernel(%arg0: memref<8x1024xf32, #tpu.memory_space<vmem>>, %arg1: memref<8x1024xf32, #tpu.memory_space<vmem>>, %arg2: memref<1024x64xbf16, #tpu.memory_space<vmem>>, %arg3: memref<1x64xf32, #tpu.memory_space<vmem>>, %arg4: memref<64x32xf32, #tpu.memory_space<vmem>>, %arg5: memref<1x32xf32, #tpu.memory_space<vmem>>, %arg6: memref<32x3xf32, #tpu.memory_space<vmem>>, %arg7: memref<1x3xf32, #tpu.memory_space<vmem>>, %arg8: memref<16x16xf32, #tpu.memory_space<vmem>>, %arg9: memref<8x128xf32, #tpu.memory_space<vmem>>) attributes {dimension_semantics = [], scalar_prefetch = 0 : i64, scratch_operands = 0 : i64, tpu.core_type = #tpu.core_type<tc>} {
    %c0 = arith.constant 0 : index
    %c0_0 = arith.constant 0 : index
    %0 = vector.load %arg2[%c0, %c0_0] : memref<1024x64xbf16, #tpu.memory_space<vmem>>, vector<1024x64xbf16>
    %c0_1 = arith.constant 0 : index
    %c0_2 = arith.constant 0 : index
    %1 = vector.load %arg0[%c0_1, %c0_2] : memref<8x1024xf32, #tpu.memory_space<vmem>>, vector<8x1024xf32>
    %2 = arith.truncf %1 : vector<8x1024xf32> to vector<8x1024xbf16>
    %cst = arith.constant dense<0.000000e+00> : vector<8x64xf32>
    %3 = tpu.matmul %2, %0, %cst {dimension_numbers = #tpu.dot_dimension_numbers<[1], [0], [0], [1], [0, 0, 1, 1], [], []>} : vector<8x1024xbf16>, vector<1024x64xbf16>, vector<8x64xf32> -> vector<8x64xf32>
    %c0_3 = arith.constant 0 : index
    %c0_4 = arith.constant 0 : index
    %4 = vector.load %arg1[%c0_3, %c0_4] : memref<8x1024xf32, #tpu.memory_space<vmem>>, vector<8x1024xf32>
    %5 = arith.truncf %4 : vector<8x1024xf32> to vector<8x1024xbf16>
    %cst_5 = arith.constant dense<0.000000e+00> : vector<8x64xf32>
    %6 = tpu.matmul %5, %0, %cst_5 {dimension_numbers = #tpu.dot_dimension_numbers<[1], [0], [0], [1], [0, 0, 1, 1], [], []>} : vector<8x1024xbf16>, vector<1024x64xbf16>, vector<8x64xf32> -> vector<8x64xf32>
    %7 = tpu.concatenate %3, %6 in 0 : vector<8x64xf32>, vector<8x64xf32> -> vector<16x64xf32>
    %c0_6 = arith.constant 0 : index
    %c0_7 = arith.constant 0 : index
    %8 = vector.load %arg3[%c0_6, %c0_7] : memref<1x64xf32, #tpu.memory_space<vmem>>, vector<1x64xf32>
    %9 = vector.broadcast %8 : vector<1x64xf32> to vector<16x64xf32>
    %10 = arith.addf %7, %9 : vector<16x64xf32>
    %cst_8 = arith.constant 0.000000e+00 : f32
    %11 = vector.broadcast %cst_8 : f32 to vector<16x64xf32>
    %12 = arith.maximumf %10, %11 : vector<16x64xf32>
    %13 = arith.truncf %12 : vector<16x64xf32> to vector<16x64xbf16>
    %c0_9 = arith.constant 0 : index
    %c0_10 = arith.constant 0 : index
    %14 = vector.load %arg4[%c0_9, %c0_10] : memref<64x32xf32, #tpu.memory_space<vmem>>, vector<64x32xf32>
    %15 = arith.truncf %14 : vector<64x32xf32> to vector<64x32xbf16>
    %c0_11 = arith.constant 0 : index
    %c0_12 = arith.constant 0 : index
    %16 = vector.load %arg6[%c0_11, %c0_12] : memref<32x3xf32, #tpu.memory_space<vmem>>, vector<32x3xf32>
    %17 = arith.truncf %16 : vector<32x3xf32> to vector<32x3xbf16>
    %cst_13 = arith.constant dense<0.000000e+00> : vector<16x32xf32>
    %18 = tpu.matmul %13, %15, %cst_13 {dimension_numbers = #tpu.dot_dimension_numbers<[1], [0], [0], [1], [0, 0, 1, 1], [], []>} : vector<16x64xbf16>, vector<64x32xbf16>, vector<16x32xf32> -> vector<16x32xf32>
    %c0_14 = arith.constant 0 : index
    %c0_15 = arith.constant 0 : index
    %19 = vector.load %arg5[%c0_14, %c0_15] : memref<1x32xf32, #tpu.memory_space<vmem>>, vector<1x32xf32>
    %20 = vector.broadcast %19 : vector<1x32xf32> to vector<16x32xf32>
    %21 = arith.addf %18, %20 : vector<16x32xf32>
    %cst_16 = arith.constant 0.000000e+00 : f32
    %22 = vector.broadcast %cst_16 : f32 to vector<16x32xf32>
    %23 = arith.maximumf %21, %22 : vector<16x32xf32>
    %24 = arith.truncf %23 : vector<16x32xf32> to vector<16x32xbf16>
    %cst_17 = arith.constant dense<0.000000e+00> : vector<16x3xf32>
    %25 = tpu.matmul %24, %17, %cst_17 {dimension_numbers = #tpu.dot_dimension_numbers<[1], [0], [0], [1], [0, 0, 1, 1], [], []>} : vector<16x32xbf16>, vector<32x3xbf16>, vector<16x3xf32> -> vector<16x3xf32>
    %c0_18 = arith.constant 0 : index
    %c0_19 = arith.constant 0 : index
    %26 = vector.load %arg7[%c0_18, %c0_19] : memref<1x3xf32, #tpu.memory_space<vmem>>, vector<1x3xf32>
    %27 = vector.broadcast %26 : vector<1x3xf32> to vector<16x3xf32>
    %28 = arith.addf %25, %27 : vector<16x3xf32>
    %29 = vector.extract_strided_slice %28 {offsets = [0, 0], sizes = [8, 3], strides = [1, 1]} : vector<16x3xf32> to vector<8x3xf32>
    %30 = vector.extract_strided_slice %28 {offsets = [8, 0], sizes = [8, 3], strides = [1, 1]} : vector<16x3xf32> to vector<8x3xf32>
    %cst_20 = arith.constant dense<0xFF800000> : vector<8xf32>
    %31 = vector.multi_reduction <maximumf>, %30, %cst_20 [1] : vector<8x3xf32> to vector<8xf32>
    %32 = vector.shape_cast %31 : vector<8xf32> to vector<8x1xf32>
    %33 = vector.broadcast %32 : vector<8x1xf32> to vector<8x3xf32>
    %34 = arith.subf %30, %33 : vector<8x3xf32>
    %35 = math.exp %34 : vector<8x3xf32>
    %cst_21 = arith.constant dense<0.000000e+00> : vector<8xf32>
    %36 = vector.multi_reduction <add>, %35, %cst_21 [1] : vector<8x3xf32> to vector<8xf32>
    %37 = vector.shape_cast %36 : vector<8xf32> to vector<8x1xf32>
    %38 = tpu.reciprocal %37 {approx = true} : vector<8x1xf32> -> vector<8x1xf32>
    %39 = vector.broadcast %38 : vector<8x1xf32> to vector<8x3xf32>
    %40 = arith.mulf %35, %39 : vector<8x3xf32>
    %41 = arith.mulf %40, %40 : vector<8x3xf32>
    %cst_22 = arith.constant dense<0.000000e+00> : vector<8xf32>
    %42 = vector.multi_reduction <add>, %41, %cst_22 [1] : vector<8x3xf32> to vector<8xf32>
    %43 = vector.shape_cast %42 : vector<8xf32> to vector<8x1xf32>
    %cst_23 = arith.constant 9.99999996E-13 : f32
    %44 = vector.broadcast %cst_23 : f32 to vector<8x1xf32>
    %45 = arith.addf %43, %44 : vector<8x1xf32>
    %46 = math.rsqrt %45 : vector<8x1xf32>
    %47 = vector.broadcast %46 : vector<8x1xf32> to vector<8x3xf32>
    %48 = arith.mulf %40, %47 : vector<8x3xf32>
    %49 = arith.truncf %48 : vector<8x3xf32> to vector<8x3xbf16>
    %cst_24 = arith.constant dense<0.000000e+00> : vector<8x8xf32>
    %50 = tpu.matmul %49, %49, %cst_24 {dimension_numbers = #tpu.dot_dimension_numbers<[1], [1], [0], [0], [0, 0, 1, 0], [], []>} : vector<8x3xbf16>, vector<8x3xbf16>, vector<8x8xf32> -> vector<8x8xf32>
    %cst_25 = arith.constant 0.899999976 : f32
    %51 = vector.broadcast %cst_25 : f32 to vector<8x8xf32>
    %52 = arith.cmpf ogt, %50, %51 : vector<8x8xf32>
    %cst_26 = arith.constant 1.000000e+00 : f32
    %cst_27 = arith.constant 0.000000e+00 : f32
    %53 = vector.broadcast %cst_26 : f32 to vector<8x8xf32>
    %54 = vector.broadcast %cst_27 : f32 to vector<8x8xf32>
    %55 = arith.select %52, %53, %54 : vector<8x8xi1>, vector<8x8xf32>
    %56 = arith.mulf %12, %12 : vector<16x64xf32>
    %cst_28 = arith.constant dense<0.000000e+00> : vector<16xf32>
    %57 = vector.multi_reduction <add>, %56, %cst_28 [1] : vector<16x64xf32> to vector<16xf32>
    %58 = vector.shape_cast %57 : vector<16xf32> to vector<16x1xf32>
    %cst_29 = arith.constant 1.000000e+00 : f32
    %59 = vector.broadcast %cst_29 : f32 to vector<1x64xf32>
    %cst_30 = arith.constant dense<0.000000e+00> : vector<1x16xf32>
    %60 = tpu.matmul %59, %56, %cst_30 {dimension_numbers = #tpu.dot_dimension_numbers<[1], [1], [0], [0], [0, 0, 1, 0], [], []>} : vector<1x64xf32>, vector<16x64xf32>, vector<1x16xf32> -> vector<1x16xf32>
    %cst_31 = arith.constant dense<0.000000e+00> : vector<16x16xf32>
    %61 = tpu.matmul %13, %13, %cst_31 {dimension_numbers = #tpu.dot_dimension_numbers<[1], [1], [0], [0], [0, 0, 1, 0], [], []>} : vector<16x64xbf16>, vector<16x64xbf16>, vector<16x16xf32> -> vector<16x16xf32>
    %62 = vector.broadcast %58 : vector<16x1xf32> to vector<16x16xf32>
    %63 = vector.broadcast %60 : vector<1x16xf32> to vector<16x16xf32>
    %64 = arith.addf %62, %63 : vector<16x16xf32>
    %cst_32 = arith.constant 2.000000e+00 : f32
    %65 = vector.broadcast %cst_32 : f32 to vector<16x16xf32>
    %66 = arith.mulf %65, %61 : vector<16x16xf32>
    %67 = arith.subf %64, %66 : vector<16x16xf32>
    %cst_33 = arith.constant 0.000000e+00 : f32
    %68 = vector.broadcast %cst_33 : f32 to vector<16x16xf32>
    %69 = arith.maximumf %67, %68 : vector<16x16xf32>
    %70 = vector.shape_cast %69 : vector<16x16xf32> to vector<1x16x16xf32>
    %cst_34 = arith.constant dense<0.000000e+00> : vector<1xf32>
    %71 = vector.multi_reduction <add>, %70, %cst_34 [1, 2] : vector<1x16x16xf32> to vector<1xf32>
    %72 = vector.shape_cast %71 : vector<1xf32> to vector<1x1x1xf32>
    %73 = vector.extract %72[0, 0, 0] : f32 from vector<1x1x1xf32>
    %74 = vector.broadcast %73 : f32 to vector<1x1xf32>
    %cst_35 = arith.constant 2.400000e+02 : f32
    %75 = vector.broadcast %cst_35 : f32 to vector<1x1xf32>
    %76 = arith.divf %74, %75 : vector<1x1xf32>
    %cst_36 = arith.constant 9.99999993E-9 : f32
    %77 = vector.broadcast %cst_36 : f32 to vector<1x1xf32>
    %78 = arith.maximumf %76, %77 : vector<1x1xf32>
    %cst_37 = arith.constant 2.500000e-01 : f32
    %79 = vector.broadcast %cst_37 : f32 to vector<1x1xf32>
    %80 = arith.mulf %78, %79 : vector<1x1xf32>
    %81 = tpu.reciprocal %80 {approx = true} : vector<1x1xf32> -> vector<1x1xf32>
    %cst_38 = arith.constant 0.000000e+00 : f32
    %82 = vector.broadcast %cst_38 : f32 to vector<1x1xf32>
    %83 = arith.subf %82, %81 : vector<1x1xf32>
    %cst_39 = arith.constant 0.000000e+00 : f32
    %84 = vector.broadcast %cst_39 : f32 to vector<16x16xf32>
    %cst_40 = arith.constant 1.000000e+00 : f32
    %85 = vector.broadcast %cst_40 : f32 to vector<1x1xf32>
    %86 = arith.mulf %83, %85 : vector<1x1xf32>
    %87 = vector.broadcast %86 : vector<1x1xf32> to vector<16x16xf32>
    %88 = arith.mulf %69, %87 : vector<16x16xf32>
    %89 = math.exp %88 : vector<16x16xf32>
    %90 = arith.addf %84, %89 : vector<16x16xf32>
    %cst_41 = arith.constant 5.000000e-01 : f32
    %91 = vector.broadcast %cst_41 : f32 to vector<1x1xf32>
    %92 = arith.mulf %83, %91 : vector<1x1xf32>
    %93 = vector.broadcast %92 : vector<1x1xf32> to vector<16x16xf32>
    %94 = arith.mulf %69, %93 : vector<16x16xf32>
    %95 = math.exp %94 : vector<16x16xf32>
    %96 = arith.addf %90, %95 : vector<16x16xf32>
    %cst_42 = arith.constant 2.500000e-01 : f32
    %97 = vector.broadcast %cst_42 : f32 to vector<1x1xf32>
    %98 = arith.mulf %83, %97 : vector<1x1xf32>
    %99 = vector.broadcast %98 : vector<1x1xf32> to vector<16x16xf32>
    %100 = arith.mulf %69, %99 : vector<16x16xf32>
    %101 = math.exp %100 : vector<16x16xf32>
    %102 = arith.addf %96, %101 : vector<16x16xf32>
    %cst_43 = arith.constant 1.250000e-01 : f32
    %103 = vector.broadcast %cst_43 : f32 to vector<1x1xf32>
    %104 = arith.mulf %83, %103 : vector<1x1xf32>
    %105 = vector.broadcast %104 : vector<1x1xf32> to vector<16x16xf32>
    %106 = arith.mulf %69, %105 : vector<16x16xf32>
    %107 = math.exp %106 : vector<16x16xf32>
    %108 = arith.addf %102, %107 : vector<16x16xf32>
    %cst_44 = arith.constant 6.250000e-02 : f32
    %109 = vector.broadcast %cst_44 : f32 to vector<1x1xf32>
    %110 = arith.mulf %83, %109 : vector<1x1xf32>
    %111 = vector.broadcast %110 : vector<1x1xf32> to vector<16x16xf32>
    %112 = arith.mulf %69, %111 : vector<16x16xf32>
    %113 = math.exp %112 : vector<16x16xf32>
    %114 = arith.addf %108, %113 : vector<16x16xf32>
    %c0_45 = arith.constant 0 : index
    %c0_46 = arith.constant 0 : index
    %115 = vector.load %arg8[%c0_45, %c0_46] : memref<16x16xf32, #tpu.memory_space<vmem>>, vector<16x16xf32>
    %116 = arith.mulf %114, %115 : vector<16x16xf32>
    %117 = vector.shape_cast %116 : vector<16x16xf32> to vector<1x16x16xf32>
    %cst_47 = arith.constant dense<0.000000e+00> : vector<1xf32>
    %118 = vector.multi_reduction <add>, %117, %cst_47 [1, 2] : vector<1x16x16xf32> to vector<1xf32>
    %119 = vector.shape_cast %118 : vector<1xf32> to vector<1x1x1xf32>
    %120 = vector.extract %119[0, 0, 0] : f32 from vector<1x1x1xf32>
    %cst_48 = arith.constant 1.250000e-01 : f32
    %121 = arith.mulf %120, %cst_48 : f32
    %cst_49 = arith.constant 0.000000e+00 : f32
    %122 = vector.broadcast %cst_49 : f32 to vector<8x1xf32>
    %123 = vector.broadcast %121 : f32 to vector<8x1xf32>
    %124 = arith.addf %122, %123 : vector<8x1xf32>
    %cst_50 = arith.constant 0.000000e+00 : f32
    %125 = vector.broadcast %cst_50 : f32 to vector<8x105xf32>
    %126 = tpu.concatenate %50, %55, %29, %40, %124, %125 in 1 : vector<8x8xf32>, vector<8x8xf32>, vector<8x3xf32>, vector<8x3xf32>, vector<8x1xf32>, vector<8x105xf32> -> vector<8x128xf32>
    %c0_51 = arith.constant 0 : index
    %c0_52 = arith.constant 0 : index
    %127 = vector.load %arg9[%c0_51, %c0_52] : memref<8x128xf32, #tpu.memory_space<vmem>>, vector<8x128xf32>
    tpu.vector_store %arg9[%c0_51, %c0_52], %126 {strides = array<i32>} : memref<8x128xf32, #tpu.memory_space<vmem>>, vector<8x128xf32>,
    return
  }
}

</mosaic_0001>

<bundles_post_ra>
// kernel: transfer_net_forward.1
= control target key start
LH: loop header
LB: loop body
LE: loop exit
PB: predicated region body
PF: predicated region fallthrough
CT: control target
= control target key end

     0   :  { %vm816_vm0 = vcmask 523264   ;;  %vm841_vm1 = vcmask 261120   ;;  %vm966_vm2 = vcmask 130048   ;;  %vm859_vm3 = vcmask 23552   ;;  %s1456_s25 = smov 8   ;;  %s2098_s2 = inlined_call_operand.vmem [shape: bf16[1024,64], index: 2, kind: input, shape index: {}]   ;;  %s2099_s0 = inlined_call_operand.vmem [shape: f32[8,1024], index: 0, kind: input, shape index: {}]   ;;  %s2100_s3 = inlined_call_operand.vmem [shape: f32[1,64], index: 3, kind: input, shape index: {}]   ;;  %s2101_s1 = inlined_call_operand.vmem [shape: f32[8,1024], index: 1, kind: input, shape index: {}]   ;;  %s2102_s4 = inlined_call_operand.vmem [shape: f32[64,32], index: 4, kind: input, shape index: {}]   ;;  %s2103_s5 = inlined_call_operand.vmem [shape: f32[1,32], index: 5, kind: input, shape index: {}]   ;;  %s2104_s7 = inlined_call_operand.vmem [shape: f32[1,3], index: 7, kind: input, shape index: {}]   ;;  %s2105_s6 = inlined_call_operand.vmem [shape: f32[32,3], index: 6, kind: input, shape index: {}]   ;;  %s2106_s8 = inlined_call_operand.vmem [shape: f32[16,16], index: 8, kind: input, shape index: {}]   ;;  %s2107_s9 = inlined_call_operand.vmem [shape: f32[8,128], index: 9, kind: output, shape index: {}]  }
   0x1   :  { %v1510_v0 = vld [vmem:[%s2098_s2 + $0x38] sm:$0xff]  ;;  %v1532_v4 = vld [vmem:[%s2098_s2 + $0x30] sm:$0xff]  ;;  %v1556_v8 = vld [vmem:[%s2098_s2 + $0x28] sm:$0xff]  ;;  %vm1067_vm9 = vcmask 64512   ;;  %vm1070_vm10 = vcmask 154624   ;;  %vm1072_vm11 = vcmask 179200  }
   0x2   :  { %v1515_v1 = vld [vmem:[%s2098_s2 + $0x78] sm:$0xff]  ;;  %561 = vmatpush.bf16.msra.mxu0 %v1510_v0  ;;  %v1537_v5 = vld [vmem:[%s2098_s2 + $0x70] sm:$0xff]  ;;  %v1561_v9 = vld [vmem:[%s2098_s2 + $0x68] sm:$0xff]  ;;  %vm1074_vm12 = vcmask 187392  }
   0x3   :  { %v1520_v2 = vld [vmem:[%s2098_s2 + $0xb8] sm:$0xff]  ;;  %574 = vmatpush.bf16.msra.mxu1 %v1515_v1  ;;  %v1544_v6 = vld [vmem:[%s2098_s2 + $0xb0] sm:$0xff]  ;;  %v1568_v10 = vld [vmem:[%s2098_s2 + $0xa8] sm:$0xff] }
   0x4   :  { %v1525_v3 = vld [vmem:[%s2098_s2 + $0xf8] sm:$0xff]  ;;  %587 = vmatpush.bf16.msra.mxu2 %v1520_v2  ;;  %v1549_v7 = vld [vmem:[%s2098_s2 + $0xf0] sm:$0xff]  ;;  %v1573_v11 = vld [vmem:[%s2098_s2 + $0xe8] sm:$0xff] }
   0x5   :  { %600 = vmatpush.bf16.msra.mxu3 %v1525_v3  ;;  %v1580_v12 = vld [vmem:[%s2098_s2 + $0x20] sm:$0xff]  ;;  %v1604_v16 = vld [vmem:[%s2098_s2 + $0x18] sm:$0xff]  ;;  %v1628_v20 = vld [vmem:[%s2098_s2 + $0x10] sm:$0xff] }
   0x6   :  { %562 = vmatpush.bf16.msra.mxu0 %v1532_v4  ;;  %v1585_v13 = vld [vmem:[%s2098_s2 + $0x60] sm:$0xff]  ;;  %v1609_v17 = vld [vmem:[%s2098_s2 + $0x58] sm:$0xff]  ;;  %v1633_v21 = vld [vmem:[%s2098_s2 + $0x50] sm:$0xff] }
   0x7   :  { %575 = vmatpush.bf16.msra.mxu1 %v1537_v5  ;;  %v1592_v14 = vld [vmem:[%s2098_s2 + $0xa0] sm:$0xff]  ;;  %v1616_v18 = vld [vmem:[%s2098_s2 + $0x98] sm:$0xff]  ;;  %v1640_v22 = vld [vmem:[%s2098_s2 + $0x90] sm:$0xff] }
   0x8   :  { %588 = vmatpush.bf16.msra.mxu2 %v1544_v6  ;;  %v1597_v15 = vld [vmem:[%s2098_s2 + $0xe0] sm:$0xff]  ;;  %v1621_v19 = vld [vmem:[%s2098_s2 + $0xd8] sm:$0xff]  ;;  %v1645_v23 = vld [vmem:[%s2098_s2 + $0xd0] sm:$0xff] }
   0x9   :  { %601 = vmatpush.bf16.msra.mxu3 %v1549_v7  ;;  %v1652_v24 = vld [vmem:[%s2098_s2 + $0x8] sm:$0xff]  ;;  %v1674_v28 = vld [vmem:[%s2098_s2] sm:$0xff]  ;;  %v1698_v32 = vld [vmem:[%s2098_s2 + $0x138] sm:$0xff] }
   0xa   :  { %563 = vmatpush.bf16.msra.mxu0 %v1556_v8  ;;  %v1657_v25 = vld [vmem:[%s2098_s2 + $0x48] sm:$0xff]  ;;  %v1681_v29 = vld [vmem:[%s2098_s2 + $0x40] sm:$0xff]  ;;  %v163_v33 = vld [vmem:[%s2099_s0 + $0x10] sm:$0xff] }
   0xb   :  { %576 = vmatpush.bf16.msra.mxu1 %v1561_v9  ;;  %v1664_v26 = vld [vmem:[%s2098_s2 + $0x88] sm:$0xff]  ;;  %v1686_v30 = vld [vmem:[%s2098_s2 + $0x80] sm:$0xff]  ;;  %v1709_v35 = vld [vmem:[%s2098_s2 + $0x178] sm:$0xff]  ;;  %v171_v40 = vpack.c.bf16 %v163_v33, %v163_v33 }
   0xc   :  { %589 = vmatpush.bf16.msra.mxu2 %v1568_v10  ;;  %v1669_v27 = vld [vmem:[%s2098_s2 + $0xc8] sm:$0xff]  ;;  %v1691_v31 = vld [vmem:[%s2098_s2 + $0xc0] sm:$0xff]  ;;  %v164_v36 = vld [vmem:[%s2099_s0 + $0x18] sm:$0xff] }
   0xd   :  { %602 = vmatpush.bf16.msra.mxu3 %v1573_v11  ;;  %v161_v34 = vld [vmem:[%s2099_s0] sm:$0xff]  ;;  %v162_v37 = vld [vmem:[%s2099_s0 + $0x8] sm:$0xff]  ;;  %v1720_v38 = vld [vmem:[%s2098_s2 + $0x1b8] sm:$0xff]  ;;  %v172_v42 = vpack.c.bf16 %v164_v36, %v164_v36 }
   0xe   :  { %564 = vmatpush.bf16.msra.mxu0 %v1580_v12  ;;  %v1725_v39 = vld [vmem:[%s2098_s2 + $0x1f8] sm:$0xff]  ;;  %v169_v41 = vpack.c.bf16 %v161_v34, %v161_v34  ;;  %v170_v43 = vpack.c.bf16 %v162_v37, %v162_v37  ;;  %v1736_v44 = vld [vmem:[%s2098_s2 + $0x130] sm:$0xff]  ;;  %v1760_v48 = vld [vmem:[%s2098_s2 + $0x128] sm:$0xff] }
   0xf   :  { %577 = vmatpush.bf16.msra.mxu1 %v1585_v13  ;;  %v1741_v45 = vld [vmem:[%s2098_s2 + $0x170] sm:$0xff]  ;;  %v1765_v49 = vld [vmem:[%s2098_s2 + $0x168] sm:$0xff]  ;;  %v1784_v52 = vld [vmem:[%s2098_s2 + $0x120] sm:$0xff] }
  0x10   :  { %590 = vmatpush.bf16.msra.mxu2 %v1592_v14  ;;  %v1748_v46 = vld [vmem:[%s2098_s2 + $0x1b0] sm:$0xff]  ;;  %v1772_v50 = vld [vmem:[%s2098_s2 + $0x1a8] sm:$0xff]  ;;  %v1789_v53 = vld [vmem:[%s2098_s2 + $0x160] sm:$0xff] }
  0x11   :  { %603 = vmatpush.bf16.msra.mxu3 %v1597_v15  ;;  %v1753_v47 = vld [vmem:[%s2098_s2 + $0x1f0] sm:$0xff]  ;;  %v1777_v51 = vld [vmem:[%s2098_s2 + $0x1e8] sm:$0xff]  ;;  %v1796_v54 = vld [vmem:[%s2098_s2 + $0x1a0] sm:$0xff] }
  0x12   :  { %565 = vmatpush.bf16.msra.mxu0 %v1604_v16  ;;  %v1801_v55 = vld [vmem:[%s2098_s2 + $0x1e0] sm:$0xff]  ;;  %v1808_v56 = vld [vmem:[%s2098_s2 + $0x118] sm:$0xff]  ;;  %v1832_v60 = vld [vmem:[%s2098_s2 + $0x110] sm:$0xff] }
  0x13   :  { %578 = vmatpush.bf16.msra.mxu1 %v1609_v17  ;;  %v1813_v57 = vld [vmem:[%s2098_s2 + $0x158] sm:$0xff]  ;;  %2116 = vst [vmem:[#allocation2_spill] sm:$0xff] %v1832_v60  ;;  %v1837_v61 = vld [vmem:[%s2098_s2 + $0x150] sm:$0xff]  ;;  %v1856_v33 = vld [vmem:[%s2098_s2 + $0x108] sm:$0xff] }
  0x14   :  { %591 = vmatpush.bf16.msra.mxu2 %v1616_v18  ;;  %v1820_v58 = vld [vmem:[%s2098_s2 + $0x198] sm:$0xff]  ;;  %2117 = vst [vmem:[#allocation3_spill] sm:$0xff] %v1837_v61  ;;  %v1844_v62 = vld [vmem:[%s2098_s2 + $0x190] sm:$0xff]  ;;  %v1861_v34 = vld [vmem:[%s2098_s2 + $0x148] sm:$0xff] }
  0x15   :  { %604 = vmatpush.bf16.msra.mxu3 %v1621_v19  ;;  %v1825_v59 = vld [vmem:[%s2098_s2 + $0x1d8] sm:$0xff]  ;;  %2118 = vst [vmem:[#allocation4_spill] sm:$0xff] %v1844_v62  ;;  %v1849_v63 = vld [vmem:[%s2098_s2 + $0x1d0] sm:$0xff]  ;;  %v1868_v36 = vld [vmem:[%s2098_s2 + $0x188] sm:$0xff] }
  0x16   :  { %566 = vmatpush.bf16.msra.mxu0 %v1628_v20  ;;  %2119 = vst [vmem:[#allocation5_spill] sm:$0xff] %v1849_v63  ;;  %v1873_v37 = vld [vmem:[%s2098_s2 + $0x1c8] sm:$0xff] }
  0x17   :  { %579 = vmatpush.bf16.msra.mxu1 %v1633_v21  ;;  %2120 = vst [vmem:[#allocation6_spill] sm:$0xff] %v1856_v33 }
  0x18   :  { %592 = vmatpush.bf16.msra.mxu2 %v1640_v22  ;;  %2121 = vst [vmem:[#allocation7_spill] sm:$0xff] %v1861_v34 }
  0x19   :  { %605 = vmatpush.bf16.msra.mxu3 %v1645_v23  ;;  %2122 = vst [vmem:[#allocation8_spill] sm:$0xff] %v1868_v36 }
  0x1a   :  { %567 = vmatpush.bf16.msra.mxu0 %v1652_v24  ;;  %2123 = vst [vmem:[#allocation9_spill] sm:$0xff] %v1873_v37 }
  0x1b   :  { %580 = vmatpush.bf16.msra.mxu1 %v1657_v25 }
  0x1c   :  { %593 = vmatpush.bf16.msra.mxu2 %v1664_v26 }
  0x1d   :  { %606 = vmatpush.bf16.msra.mxu3 %v1669_v27 }
  0x1e   :  { %568 = vmatpush.bf16.msra.mxu0 %v1674_v28 }
  0x1f   :  { %581 = vmatpush.bf16.msra.mxu1 %v1681_v29 }
  0x20   :  { %594 = vmatpush.bf16.msra.mxu2 %v1686_v30 }
  0x21   :  { %607 = vmatpush.bf16.msra.mxu3 %v1691_v31  ;;  %569 = vmatmul.bf16.vlgmr.msra.gmra.mxu0 %v169_v41  ;;  %v1885_v41 = vld [vmem:[%s2098_s2 + $0x140] sm:$0xff] }
  0x22   :  { %613 = vmatpush.bf16.msrb.mxu0 %v1698_v32  ;;  %582 = vmatmul.bf16.vlgmr.msra.gmra.mxu1 %v170_v43  ;;  %v1897_v43 = vld [vmem:[%s2098_s2 + $0x1c0] sm:$0xff] }
  0x23   :  { %626 = vmatpush.bf16.msrb.mxu1 %v1709_v35  ;;  %595 = vmatmul.bf16.vlgmr.msra.gmra.mxu2 %v171_v40  ;;  %v1880_v40 = vld [vmem:[%s2098_s2 + $0x100] sm:$0xff] }
  0x24   :  { %639 = vmatpush.bf16.msrb.mxu2 %v1720_v38  ;;  %608 = vmatmul.bf16.vlgmr.msra.gmra.mxu3 %v172_v42  ;;  %v1890_v42 = vld [vmem:[%s2098_s2 + $0x180] sm:$0xff] }
  0x25   :  { %652 = vmatpush.bf16.msrb.mxu3 %v1725_v39 }
  0x26   :  { %614 = vmatpush.bf16.msrb.mxu0 %v1736_v44 }
  0x27   :  { %627 = vmatpush.bf16.msrb.mxu1 %v1741_v45 }
  0x28   :  { %640 = vmatpush.bf16.msrb.mxu2 %v1748_v46 }
  0x29   :  { %653 = vmatpush.bf16.msrb.mxu3 %v1753_v47 }
  0x2a   :  { %615 = vmatpush.bf16.msrb.mxu0 %v1760_v48 }
  0x2b   :  { %628 = vmatpush.bf16.msrb.mxu1 %v1765_v49 }
  0x2c   :  { %641 = vmatpush.bf16.msrb.mxu2 %v1772_v50 }
  0x2d   :  { %654 = vmatpush.bf16.msrb.mxu3 %v1777_v51 }
  0x2e   :  { %616 = vmatpush.bf16.msrb.mxu0 %v1784_v52 }
  0x2f   :  { %629 = vmatpush.bf16.msrb.mxu1 %v1789_v53 }
  0x30   :  { %642 = vmatpush.bf16.msrb.mxu2 %v1796_v54 }
  0x31   :  { %655 = vmatpush.bf16.msrb.mxu3 %v1801_v55 }
  0x32   :  { %617 = vmatpush.bf16.msrb.mxu0 %v1808_v56 }
  0x33   :  { %630 = vmatpush.bf16.msrb.mxu1 %v1813_v57 }
  0x34   :  { %643 = vmatpush.bf16.msrb.mxu2 %v1820_v58 }
  0x35   :  { %656 = vmatpush.bf16.msrb.mxu3 %v1825_v59 }
  0x36   :  { %618 = vmatpush.bf16.msrb.mxu0 %v1832_v60 }
  0x37   :  { %631 = vmatpush.bf16.msrb.mxu1 %v1837_v61 }
  0x38   :  { %644 = vmatpush.bf16.msrb.mxu2 %v1844_v62 }
  0x39   :  { %657 = vmatpush.bf16.msrb.mxu3 %v1849_v63  ;;  %v168_v63 = vld [vmem:[%s2099_s0 + $0x38] sm:$0xff] }
  0x3a   :  { %619 = vmatpush.bf16.msrb.mxu0 %v1856_v33  ;;  %v165_v33 = vld [vmem:[%s2099_s0 + $0x20] sm:$0xff]  ;;  %v176_v61 = vpack.c.bf16 %v168_v63, %v168_v63 }
  0x3b   :  { %632 = vmatpush.bf16.msrb.mxu1 %v1861_v34  ;;  %v167_v34 = vld [vmem:[%s2099_s0 + $0x30] sm:$0xff]  ;;  %v173_v62 = vpack.c.bf16 %v165_v33, %v165_v33 }
  0x3c   :  { %645 = vmatpush.bf16.msrb.mxu2 %v1868_v36  ;;  %v175_v36 = vpack.c.bf16 %v167_v34, %v167_v34  ;;  %v798_v34 = vld [vmem:[%s2102_s4 + $0x20] sm:$0xff] }
  0x3d   :  { %658 = vmatpush.bf16.msrb.mxu3 %v1873_v37  ;;  %v166_v37 = vld [vmem:[%s2099_s0 + $0x28] sm:$0xff] }
  0x3e   :  { %620 = vmatpush.bf16.msrb.mxu0 %v1880_v40  ;;  %v174_v60 = vpack.c.bf16 %v166_v37, %v166_v37 }
  0x3f   :  { %633 = vmatpush.bf16.msrb.mxu1 %v1885_v41 }
  0x40   :  { %646 = vmatpush.bf16.msrb.mxu2 %v1890_v42 }
  0x41   :  { %659 = vmatpush.bf16.msrb.mxu3 %v1897_v43  ;;  %621 = vmatmul.bf16.vlgmr.msrb.gmra.mxu0 %v173_v62 }
  0x42   :  { %681 = vmatpush.bf16.msra.mxu0 %v1510_v0  ;;  %634 = vmatmul.bf16.vlgmr.msrb.gmra.mxu1 %v174_v60  ;;  %v667_v0 = vld [vmem:[%s2101_s1 + $0x10] sm:$0xff] }
  0x43   :  { %694 = vmatpush.bf16.msra.mxu1 %v1515_v1  ;;  %647 = vmatmul.bf16.vlgmr.msrb.gmra.mxu2 %v175_v36  ;;  %v665_v1 = vld [vmem:[%s2101_s1] sm:$0xff]  ;;  %v800_v60 = vld [vmem:[%s2102_s4 + $0x30] sm:$0xff]  ;;  %v799_v36 = vld [vmem:[%s2102_s4 + $0x28] sm:$0xff] }
  0x44   :  { %707 = vmatpush.bf16.msra.mxu2 %v1520_v2  ;;  %660 = vmatmul.bf16.vlgmr.msrb.gmra.mxu3 %v176_v61  ;;  %v668_v2 = vld [vmem:[%s2101_s1 + $0x18] sm:$0xff]  ;;  %v804_v37 = vpack.c.bf16 %v799_v36, %v798_v34 }
  0x45   :  { %720 = vmatpush.bf16.msra.mxu3 %v1525_v3  ;;  %v666_v3 = vld [vmem:[%s2101_s1 + $0x8] sm:$0xff]  ;;  %v801_v61 = vld [vmem:[%s2102_s4 + $0x38] sm:$0xff] }
  0x46   :  { %682 = vmatpush.bf16.msra.mxu0 %v1532_v4  ;;  %v675_v4 = vpack.c.bf16 %v667_v0, %v667_v0  ;;  %v805_v62 = vpack.c.bf16 %v801_v61, %v800_v60 }
  0x47   :  { %695 = vmatpush.bf16.msra.mxu1 %v1537_v5  ;;  %v673_v5 = vpack.c.bf16 %v665_v1, %v665_v1 }
  0x48   :  { %708 = vmatpush.bf16.msra.mxu2 %v1544_v6  ;;  %v676_v6 = vpack.c.bf16 %v668_v2, %v668_v2 }
  0x49   :  { %721 = vmatpush.bf16.msra.mxu3 %v1549_v7  ;;  %v674_v7 = vpack.c.bf16 %v666_v3, %v666_v3  ;;  %v794_v3 = vld [vmem:[%s2102_s4] sm:$0xff] }
  0x4a   :  { %683 = vmatpush.bf16.msra.mxu0 %v1556_v8  ;;  %v2124_v8 = vld [vmem:[#allocation2_spill] sm:$0xff] }
  0x4b   :  { %696 = vmatpush.bf16.msra.mxu1 %v1561_v9  ;;  %v2125_v9 = vld [vmem:[#allocation3_spill] sm:$0xff] }
  0x4c   :  { %709 = vmatpush.bf16.msra.mxu2 %v1568_v10  ;;  %v2126_v10 = vld [vmem:[#allocation4_spill] sm:$0xff] }
  0x4d   :  { %722 = vmatpush.bf16.msra.mxu3 %v1573_v11  ;;  %v2127_v11 = vld [vmem:[#allocation5_spill] sm:$0xff] }
  0x4e   :  { %684 = vmatpush.bf16.msra.mxu0 %v1580_v12  ;;  %v2128_v12 = vld [vmem:[#allocation6_spill] sm:$0xff] }
  0x4f   :  { %697 = vmatpush.bf16.msra.mxu1 %v1585_v13  ;;  %v2129_v13 = vld [vmem:[#allocation7_spill] sm:$0xff] }
  0x50   :  { %710 = vmatpush.bf16.msra.mxu2 %v1592_v14  ;;  %v669_v14 = vld [vmem:[%s2101_s1 + $0x20] sm:$0xff] }
  0x51   :  { %723 = vmatpush.bf16.msra.mxu3 %v1597_v15  ;;  %v670_v15 = vld [vmem:[%s2101_s1 + $0x28] sm:$0xff] }
  0x52   :  { %685 = vmatpush.bf16.msra.mxu0 %v1604_v16  ;;  %v2130_v16 = vld [vmem:[#allocation8_spill] sm:$0xff] }
  0x53   :  { %698 = vmatpush.bf16.msra.mxu1 %v1609_v17  ;;  %v2131_v17 = vld [vmem:[#allocation9_spill] sm:$0xff] }
  0x54   :  { %711 = vmatpush.bf16.msra.mxu2 %v1616_v18  ;;  %v671_v18 = vld [vmem:[%s2101_s1 + $0x30] sm:$0xff] }
  0x55   :  { %724 = vmatpush.bf16.msra.mxu3 %v1621_v19  ;;  %v672_v19 = vld [vmem:[%s2101_s1 + $0x38] sm:$0xff] }
  0x56   :  { %686 = vmatpush.bf16.msra.mxu0 %v1628_v20  ;;  %v677_v20 = vpack.c.bf16 %v669_v14, %v669_v14 }
  0x57   :  { %699 = vmatpush.bf16.msra.mxu1 %v1633_v21  ;;  %v678_v21 = vpack.c.bf16 %v670_v15, %v670_v15 }
  0x58   :  { %712 = vmatpush.bf16.msra.mxu2 %v1640_v22  ;;  %v679_v22 = vpack.c.bf16 %v671_v18, %v671_v18 }
  0x59   :  { %725 = vmatpush.bf16.msra.mxu3 %v1645_v23  ;;  %v680_v23 = vpack.c.bf16 %v672_v19, %v672_v19 }
  0x5a   :  { %687 = vmatpush.bf16.msra.mxu0 %v1652_v24 }
  0x5b   :  { %700 = vmatpush.bf16.msra.mxu1 %v1657_v25 }
  0x5c   :  { %713 = vmatpush.bf16.msra.mxu2 %v1664_v26 }
  0x5d   :  { %726 = vmatpush.bf16.msra.mxu3 %v1669_v27 }
  0x5e   :  { %688 = vmatpush.bf16.msra.mxu0 %v1674_v28 }
  0x5f   :  { %701 = vmatpush.bf16.msra.mxu1 %v1681_v29 }
  0x60   :  { %714 = vmatpush.bf16.msra.mxu2 %v1686_v30 }
  0x61   :  { %727 = vmatpush.bf16.msra.mxu3 %v1691_v31  ;;  %689 = vmatmul.bf16.vlgmr.msra.gmra.mxu0 %v673_v5 }
  0x62   :  { %733 = vmatpush.bf16.msrb.mxu0 %v1698_v32  ;;  %702 = vmatmul.bf16.vlgmr.msra.gmra.mxu1 %v674_v7 }
  0x63   :  { %746 = vmatpush.bf16.msrb.mxu1 %v1709_v35  ;;  %715 = vmatmul.bf16.vlgmr.msra.gmra.mxu2 %v675_v4  ;;  %v795_v4 = vld [vmem:[%s2102_s4 + $0x8] sm:$0xff] }
  0x64   :  { %759 = vmatpush.bf16.msrb.mxu2 %v1720_v38  ;;  %728 = vmatmul.bf16.vlgmr.msra.gmra.mxu3 %v676_v6  ;;  %v802_v5 = vpack.c.bf16 %v795_v4, %v794_v3 }
  0x65   :  { %772 = vmatpush.bf16.msrb.mxu3 %v1725_v39 }
  0x66   :  { %734 = vmatpush.bf16.msrb.mxu0 %v1736_v44 }
  0x67   :  { %747 = vmatpush.bf16.msrb.mxu1 %v1741_v45 }
  0x68   :  { %760 = vmatpush.bf16.msrb.mxu2 %v1748_v46 }
  0x69   :  { %773 = vmatpush.bf16.msrb.mxu3 %v1753_v47 }
  0x6a   :  { %735 = vmatpush.bf16.msrb.mxu0 %v1760_v48 }
  0x6b   :  { %748 = vmatpush.bf16.msrb.mxu1 %v1765_v49 }
  0x6c   :  { %761 = vmatpush.bf16.msrb.mxu2 %v1772_v50  ;;  %v1418_v50 = vld [vmem:[%s2100_s3] ss:$0 sm:$0xff]  ;;  %s1453_s3 = smov 19  }
  0x6d   :  { %774 = vmatpush.bf16.msrb.mxu3 %v1777_v51 }
  0x6e   :  { %736 = vmatpush.bf16.msrb.mxu0 %v1784_v52 }
  0x6f   :  { %749 = vmatpush.bf16.msrb.mxu1 %v1789_v53 }
  0x70   :  { %762 = vmatpush.bf16.msrb.mxu2 %v1796_v54 }
  0x71   :  { %775 = vmatpush.bf16.msrb.mxu3 %v1801_v55 }
  0x72   :  { %737 = vmatpush.bf16.msrb.mxu0 %v1808_v56 }
  0x73   :  { %750 = vmatpush.bf16.msrb.mxu1 %v1813_v57 }
  0x74   :  { %763 = vmatpush.bf16.msrb.mxu2 %v1820_v58 }
  0x75   :  { %776 = vmatpush.bf16.msrb.mxu3 %v1825_v59 }
  0x76   :  { %738 = vmatpush.bf16.msrb.mxu0 %v2124_v8 }
  0x77   :  { %751 = vmatpush.bf16.msrb.mxu1 %v2125_v9 }
  0x78   :  { %764 = vmatpush.bf16.msrb.mxu2 %v2126_v10 }
  0x79   :  { %777 = vmatpush.bf16.msrb.mxu3 %v2127_v11 }
  0x7a   :  { %739 = vmatpush.bf16.msrb.mxu0 %v2128_v12 }
  0x7b   :  { %752 = vmatpush.bf16.msrb.mxu1 %v2129_v13 }
  0x7c   :  { %765 = vmatpush.bf16.msrb.mxu2 %v2130_v16 }
  0x7d   :  { %778 = vmatpush.bf16.msrb.mxu3 %v2131_v17 }
  0x7e   :  { %740 = vmatpush.bf16.msrb.mxu0 %v1880_v40  ;;  %v796_v40 = vld [vmem:[%s2102_s4 + $0x10] sm:$0xff] }
  0x7f   :  { %753 = vmatpush.bf16.msrb.mxu1 %v1885_v41  ;;  %v797_v41 = vld [vmem:[%s2102_s4 + $0x18] sm:$0xff] }
  0x80   :  { %766 = vmatpush.bf16.msrb.mxu2 %v1890_v42 }
  0x81   :  { %779 = vmatpush.bf16.msrb.mxu3 %v1897_v43  ;;  %741 = vmatmul.bf16.vlgmr.msrb.gmra.mxu0 %v677_v20  ;;  %v803_v43 = vpack.c.bf16 %v797_v41, %v796_v40  ;;  %v1420_v41 = vld [vmem:[%s2104_s7] ss:$0 sm:$0xff] }
  0x82   :  { %754 = vmatmul.bf16.vlgmr.msrb.gmra.mxu1 %v678_v21  ;;  %824 = vmatpush.bf16.msra.mxu0 %v805_v62 }
  0x83   :  { %767 = vmatmul.bf16.vlgmr.msrb.gmra.mxu2 %v679_v22 }
  0x84   :  { %780 = vmatmul.bf16.vlgmr.msrb.gmra.mxu3 %v680_v23 }
  0x86   :  { %825 = vmatpush.bf16.msra.mxu0 %v804_v37 }
  0x8a   :  { %826 = vmatpush.bf16.msra.mxu0 %v803_v43 }
  0x8e   :  { %827 = vmatpush.bf16.msra.mxu0 %v802_v5 }
  0x9e   :  { %v570_v24 = vpop.f32.mrf.mxu0 }
  0x9f   :  { %v583_v25 = vpop.f32.mrf.mxu1 }
  0xa0   :  { %v584_v32 = vadd.f32 %v583_v25, %v570_v24 }
  0xa6   :  { %v596_v26 = vpop.f32.mrf.mxu2  ;;  %v572_v28 = vpop.f32.mrf.mxu0 }
  0xa7   :  { %v609_v27 = vpop.f32.mrf.mxu3  ;;  %v585_v29 = vpop.f32.mrf.mxu1  ;;  %v597_v35 = vadd.f32 %v596_v26, %v584_v32 }
  0xa8   :  { %v1451_v29 = vmov 1.0  }
  0xa9   :  { %v610_v38 = vadd.f32 %v609_v27, %v597_v35  ;;  %v806_v35 = vld [vmem:[%s2105_s6] sm:$0xff] }
  0xae   :  { %v598_v30 = vpop.f32.mrf.mxu2 }
  0xaf   :  { %v611_v31 = vpop.f32.mrf.mxu3  ;;  %v808_v30 = vld [vmem:[%s2105_s6 + $0x10] sm:$0xff] }
  0xb0   :  { %v809_v31 = vld [vmem:[%s2105_s6 + $0x18] sm:$0xff] }
  0xb1   :  { %v811_v32 = vpack.c.bf16 %v809_v31, %v808_v30 }
  0xb3   :  { %851 = vmatpush.bf16.msra.mxu1 %v811_v32 }
  0xbe   :  { %v622_v39 = vpop.f32.mrf.mxu0 }
  0xbf   :  { %v623_v44 = vadd.f32 %v622_v39, %v610_v38  ;;  %v635_v45 = vpop.f32.mrf.mxu1  ;;  %v807_v38 = vld [vmem:[%s2105_s6 + $0x8] sm:$0xff] }
  0xc0   :  { %v810_v39 = vpack.c.bf16 %v807_v38, %v806_v35 }
  0xc1   :  { %v636_v46 = vadd.f32 %v635_v45, %v623_v44  ;;  %v1419_v45 = vld [vmem:[%s2103_s5] ss:$0 sm:$0xff] }
  0xc2   :  { %852 = vmatpush.bf16.msra.mxu1 %v810_v39 }
  0xc6   :  { %v648_v47 = vpop.f32.mrf.mxu2  ;;  %v624_v51 = vpop.f32.mrf.mxu0 }
  0xc7   :  { %v649_v48 = vadd.f32 %v648_v47, %v636_v46  ;;  %v661_v49 = vpop.f32.mrf.mxu3  ;;  %v637_v53 = vpop.f32.mrf.mxu1 }
  0xc9   :  { %v662_v52 = vadd.f32 %v661_v49, %v649_v48 }
  0xcb   :  { %v789_v54 = vadd.f32 %v1418_v50, %v662_v52 }
  0xcd   :  { %v791_v55 = vmax.f32 %v789_v54, 0.0 }
  0xce   :  { %v650_v56 = vpop.f32.mrf.mxu2 }
  0xcf   :  { %v906_v57 = vmul.f32 %v791_v55, %v791_v55  ;;  %v663_v58 = vpop.f32.mrf.mxu3 }
  0xd1   :  { %v908_v59 = vsel %vm816_vm0, %v906_v57, 0.0 }
  0xd2   :  { %909 = vadd.xlane.f32.xlu1 %v908_v59 }
  0xde   :  { %v690_v63 = vpop.f32.mrf.mxu0 }
  0xdf   :  { %v703_v33 = vpop.f32.mrf.mxu1 }
  0xe0   :  { %v704_v8 = vadd.f32 %v703_v33, %v690_v63 }
  0xe6   :  { %v716_v42 = vpop.f32.mrf.mxu2  ;;  %v692_v1 = vpop.f32.mrf.mxu0 }
  0xe7   :  { %v729_v0 = vpop.f32.mrf.mxu3  ;;  %v705_v2 = vpop.f32.mrf.mxu1  ;;  %v717_v9 = vadd.f32 %v716_v42, %v704_v8 }
  0xe9   :  { %v730_v10 = vadd.f32 %v729_v0, %v717_v9 }
  0xee   :  { %v718_v6 = vpop.f32.mrf.mxu2 }
  0xef   :  { %v731_v7 = vpop.f32.mrf.mxu3 }
  0xfe   :  { %v742_v11 = vpop.f32.mrf.mxu0 }
  0xff   :  { %v755_v12 = vpop.f32.mrf.mxu1  ;;  %v743_v13 = vadd.f32 %v742_v11, %v730_v10  ;;  %v1452_v10 = vmov 240.0  }
 0x100   :  { %1421 = vrcp.f32 %v1452_v10 }
 0x101   :  { %v756_v14 = vadd.f32 %v755_v12, %v743_v13 }
 0x106   :  { %v768_v15 = vpop.f32.mrf.mxu2  ;;  %v744_v18 = vpop.f32.mrf.mxu0 }
 0x107   :  { %v781_v16 = vpop.f32.mrf.mxu3  ;;  %v769_v17 = vadd.f32 %v768_v15, %v756_v14  ;;  %v757_v19 = vpop.f32.mrf.mxu1 }
 0x108   :  { %v1422_v11 = vpop.eup %1421 }
 0x109   :  { %v782_v20 = vadd.f32 %v781_v16, %v769_v17  ;;  %v981_v12 = vmul.f32 240.0, %v1422_v11  ;;  %vm985_vm4 = vweird.f32 %v1422_v11 }
 0x10b   :  { %v790_v21 = vadd.f32 %v1418_v50, %v782_v20  ;;  %v982_v13 = vsub.f32 1.0, %v981_v12 }
 0x10d   :  { %v792_v22 = vmax.f32 %v790_v21, 0.0  ;;  %v983_v14 = vmul.f32 %v1422_v11, %v982_v13 }
 0x10e   :  { %v770_v23 = vpop.f32.mrf.mxu2 }
 0x10f   :  { %v783_v24 = vpop.f32.mrf.mxu3  ;;  %v793_v25 = vpack.c.bf16 %v792_v22, %v791_v55  ;;  %v907_v26 = vmul.f32 %v792_v22, %v792_v22  ;;  %v984_v15 = vadd.f32 %v1422_v11, %v983_v14 }
 0x111   :  { %1337 = vmatmul.msk.bf16.vlgmr.msra.gmra.mxu0 %vm816_vm0, %v793_v25  ;;  %1340 = vmatpush.xpose.msk.msra.mxu3 %vm816_vm0, %v907_v26  ;;  %v911_v27 = vsel %vm816_vm0, %v907_v26, 0.0  ;;  %v818_v28 = vsel %vm816_vm0, %v793_v25, 0  ;;  %v986_v16 = vsel %vm985_vm4, %v1422_v11, %v984_v15 }
 0x112   :  { %912 = vadd.xlane.f32.xlu1 %v911_v27 }
 0x115   :  { %1341 = vmatpush.xpose.msk.msra.mxu3 %vm816_vm0, %v906_v57 }
 0x118   :  { %1342 = vmatmul.msk.f32.vlgmr.msra.gmra.mxu3 %vm816_vm0, %v1451_v29 }
 0x119   :  { %950 = vmatpush.bf16.xpose.msrb.mxu3 %v818_v28 }
 0x120   :  { %1343 = vmatmul.msk.bf16.vlgmr.msrb.gmra.mxu3 %vm816_vm0, %v793_v25 }
 0x145   :  { %v910_v53 = vpop.xlane.xlu1 %909 }
 0x185   :  { %v913_v59 = vpop.xlane.xlu1 %912 }
 0x18e   :  { %v829_v44 = vpop.f32.mrf.mxu0 }
 0x18f   :  { %v830_v46 = vadd.f32 %v1419_v45, %v829_v44 }
 0x191   :  { %v834_v49 = vmax.f32 %v830_v46, 0.0 }
 0x196   :  { %v831_v47 = vpop.f32.mrf.mxu0 }
 0x197   :  { %v832_v48 = vadd.f32 %v1419_v45, %v831_v47 }
 0x199   :  { %v835_v50 = vmax.f32 %v832_v48, 0.0 }
 0x19b   :  { %v836_v51 = vpack.c.bf16 %v835_v50, %v834_v49  ;;  %v940_v52 = vpop.f32.mrf.mxu3 }
 0x19c   :  { %v957_v55 = vperm.slane %v940_v52, 0 }
 0x19d   :  { %1338 = vmatmul.msk.bf16.vlgmr.msra.gmra.mxu1 %vm841_vm1, %v836_v51 }
 0x19e   :  { %v958_v57 = vadd.f32 %v957_v55, %v910_v53  ;;  %v959_v61 = vadd.f32 %v957_v55, %v913_v59 }
 0x1a3   :  { %v952_v54 = vpop.f32.mrf.mxu3 }
 0x1a4   :  { %v960_v56 = vmul.f32 2.0, %v952_v54 }
 0x1a6   :  { %v962_v58 = vsub.f32 %v958_v57, %v960_v56 }
 0x1a8   :  { %v2053_v63 = vmax.f32 %v962_v58, 0.0 }
 0x1aa   :  { %v967_v36 = vsel %vm966_vm2, %v2053_v63, 0.0 }
 0x1ab   :  { %v954_v60 = vpop.f32.mrf.mxu3 }
 0x1ac   :  { %v961_v62 = vmul.f32 2.0, %v954_v60 }
 0x1ae   :  { %v963_v33 = vsub.f32 %v959_v61, %v961_v62 }
 0x1b0   :  { %v2055_v34 = vmax.f32 %v963_v33, 0.0 }
 0x1b2   :  { %v968_v37 = vsel %vm966_vm2, %v2055_v34, 0.0 }
 0x1b3   :  { %v969_v40 = vadd.f32 %v968_v37, %v967_v36 }
 0x1b5   :  { %970 = vadd.xlane.f32.xlu2 %v969_v40 }
 0x21a   :  { %v854_v42 = vpop.f32.mrf.mxu1 }
 0x21b   :  { %v2064_v43 = vadd.f32 %v1420_v41, %v854_v42 }
 0x222   :  { %v856_v0 = vpop.f32.mrf.mxu1 }
 0x223   :  { %v2066_v1 = vadd.f32 %v1420_v41, %v856_v0 }
 0x225   :  { %v860_v2 = vsel %vm859_vm3, %v2066_v1, -inf }
 0x226   :  { %861 = vmax.xlane.f32.xlu0 %v860_v2 }
 0x228   :  { %v971_v3 = vpop.xlane.xlu2 %970 }
 0x229   :  { %v972_v4 = vrot.slane %v971_v3, 4 }
 0x22b   :  { %v973_v5 = vadd.f32 %v972_v4, %v971_v3 }
 0x22d   :  { %v974_v6 = vrot.slane %v973_v5, 2 }
 0x22f   :  { %v975_v7 = vadd.f32 %v974_v6, %v973_v5  ;;  %v1036_v6 = vld [vmem:[%s2106_s8] sm:$0xff] }
 0x231   :  { %v976_v8 = vrot.slane %v975_v7, 1 }
 0x233   :  { %v977_v9 = vadd.f32 %v976_v8, %v975_v7  ;;  %v1037_v7 = vld [vmem:[%s2106_s8 + $0x8] sm:$0xff]  ;;  %s1454_s8 = smov 16  }
 0x235   :  { %1408 = vpush %v977_v9 }
 0x266   :  { %s1409_s7 = spop %1408 }
 0x267   :  { %v979_v17 = vstv %s1409_s7 }
 0x268   :  { %v987_v18 = vmul.f32 %v986_v16, %v979_v17 }
 0x26a   :  { %v988_v19 = vmax.f32 %v987_v18, 1e-08 }
 0x26c   :  { %v989_v20 = vmul.f32 0.25, %v988_v19 }
 0x26e   :  { %1423 = vrcp.f32 %v989_v20 }
 0x274   :  { %v1424_v21 = vpop.eup %1423 }
 0x275   :  { %v991_v22 = vsub.f32 0.0, %v1424_v21 }
 0x277   :  { %v1000_v23 = vmul.f32 0.5, %v991_v22  ;;  %v992_v26 = vmul.f32 %v991_v22, %v2053_v63  ;;  %v1009_v27 = vmul.f32 0.25, %v991_v22  ;;  %v993_v28 = vmul.f32 %v991_v22, %v2055_v34 }
 0x278   :  { %v1018_v35 = vmul.f32 0.125, %v991_v22  ;;  %v1027_v46 = vmul.f32 0.0625, %v991_v22 }
 0x279   :  { %v1001_v24 = vmul.f32 %v1000_v23, %v2053_v63  ;;  %v1002_v25 = vmul.f32 %v1000_v23, %v2055_v34  ;;  %v994_v31 = vmul.f32 1.442695, %v992_v26  ;;  %v1010_v32 = vmul.f32 %v1009_v27, %v2053_v63 }
 0x27a   :  { %v996_v38 = vmul.f32 1.442695, %v993_v28  ;;  %v1011_v39 = vmul.f32 %v1009_v27, %v2055_v34  ;;  %v1019_v45 = vmul.f32 %v1018_v35, %v2053_v63  ;;  %v1020_v48 = vmul.f32 %v1018_v35, %v2055_v34 }
 0x27b   :  { %v1003_v29 = vmul.f32 1.442695, %v1001_v24  ;;  %v1005_v30 = vmul.f32 1.442695, %v1002_v25  ;;  %v1012_v44 = vmul.f32 1.442695, %v1010_v32  ;;  %v1028_v51 = vmul.f32 %v1027_v46, %v2053_v63 }
 0x27c   :  { %v1014_v47 = vmul.f32 1.442695, %v1011_v39  ;;  %v1021_v50 = vmul.f32 1.442695, %v1019_v45  ;;  %v1023_v53 = vmul.f32 1.442695, %v1020_v48  ;;  %v1029_v54 = vmul.f32 %v1027_v46, %v2055_v34 }
 0x27d   :  { %1425 = vpow2.f32 %v1003_v29  ;;  %v1030_v59 = vmul.f32 1.442695, %v1028_v51  ;;  %v1455_v46 = vmov 0.0  }
 0x27e   :  { %1427 = vpow2.f32 %v1005_v30  ;;  %v1032_v60 = vmul.f32 1.442695, %v1029_v54 }
 0x27f   :  { %1429 = vpow2.f32 %v994_v31 }
 0x280   :  { %1431 = vpow2.f32 %v996_v38 }
 0x281   :  { %1433 = vpow2.f32 %v1012_v44 }
 0x282   :  { %1435 = vpow2.f32 %v1014_v47 }
 0x283   :  { %v1426_v49 = vpop.eup %1425  ;;  %1437 = vpow2.f32 %v1021_v50 }
 0x284   :  { %v1428_v52 = vpop.eup %1427  ;;  %1439 = vpow2.f32 %v1023_v53 }
 0x285   :  { %v1430_v55 = vpop.eup %1429  ;;  %1441 = vpow2.f32 %v1030_v59 }
 0x286   :  { %v1432_v56 = vpop.eup %1431  ;;  %v1007_v57 = vadd.f32 %v1430_v55, %v1426_v49  ;;  %1443 = vpow2.f32 %v1032_v60 }
 0x287   :  { %v1008_v58 = vadd.f32 %v1432_v56, %v1428_v52  ;;  %v1434_v61 = vpop.eup %1433 }
 0x288   :  { %v1436_v62 = vpop.eup %1435  ;;  %v1016_v36 = vadd.f32 %v1434_v61, %v1007_v57 }
 0x289   :  { %v1017_v37 = vadd.f32 %v1436_v62, %v1008_v58  ;;  %v1438_v40 = vpop.eup %1437 }
 0x28a   :  { %v1440_v41 = vpop.eup %1439  ;;  %v1025_v42 = vadd.f32 %v1438_v40, %v1016_v36 }
 0x28b   :  { %v1026_v0 = vadd.f32 %v1440_v41, %v1017_v37  ;;  %v1442_v2 = vpop.eup %1441 }
 0x28c   :  { %v1444_v3 = vpop.eup %1443  ;;  %v1034_v4 = vadd.f32 %v1442_v2, %v1025_v42 }
 0x28d   :  { %v1035_v5 = vadd.f32 %v1444_v3, %v1026_v0 }
 0x28e   :  { %v1038_v9 = vmul.f32 %v1036_v6, %v1034_v4 }
 0x28f   :  { %v1039_v10 = vmul.f32 %v1037_v7, %v1035_v5 }
 0x290   :  { %v1040_v11 = vsel %vm966_vm2, %v1038_v9, 0.0 }
 0x291   :  { %v1041_v12 = vsel %vm966_vm2, %v1039_v10, 0.0 }
 0x292   :  { %v1042_v13 = vadd.f32 %v1041_v12, %v1040_v11 }
 0x299   :  { %v862_v33 = vpop.xlane.xlu0 %861 }
 0x29a   :  { %v863_v63 = vsub.f32 %v2066_v1, %v862_v33 }
 0x29c   :  { %v864_v34 = vmul.f32 1.442695, %v863_v63 }
 0x29e   :  { %1445 = vpow2.f32 %v864_v34 }
 0x2a4   :  { %v1446_v1 = vpop.eup %1445 }
 0x2a5   :  { %v866_v8 = vsel %vm859_vm3, %v1446_v1, 0.0 }
 0x2a6   :  { %867 = vadd.xlane.f32.xlu0 %v866_v8 }
 0x2ae   :  { %1043 = vadd.xlane.f32.xlu0 %v1042_v13 }
 0x319   :  { %v868_v14 = vpop.xlane.xlu0 %867 }
 0x31a   :  { %1447 = vrcp.f32 %v868_v14 }
 0x320   :  { %v1448_v15 = vpop.eup %1447 }
 0x321   :  { %v1044_v16 = vpop.xlane.xlu0 %1043  ;;  %v870_v17 = vmul.f32 %v1448_v15, %v1446_v1 }
 0x322   :  { %v1045_v18 = vrot.slane %v1044_v16, 4 }
 0x323   :  { %1064 = vrot.lane.b32.xlu0 %v870_v17, %s1453_s3  ;;  %v871_v19 = vmul.f32 %v870_v17, %v870_v17 }
 0x324   :  { %v1046_v20 = vadd.f32 %v1045_v18, %v1044_v16 }
 0x325   :  { %v872_v21 = vsel %vm859_vm3, %v871_v19, 0.0 }
 0x326   :  { %v1047_v22 = vrot.slane %v1046_v20, 2  ;;  %873 = vadd.xlane.f32.xlu2 %v872_v21 }
 0x328   :  { %v1048_v23 = vadd.f32 %v1047_v22, %v1046_v20 }
 0x32a   :  { %v1049_v24 = vrot.slane %v1048_v23, 1 }
 0x32c   :  { %v1050_v25 = vadd.f32 %v1049_v24, %v1048_v23 }
 0x32e   :  { %1410 = vpush %v1050_v25 }
 0x33e   :  { %1060 = vrot.lane.b32.xlu2 %v2064_v43, %s1454_s8 }
 0x35f   :  { %s1411_s26 = spop %1410 }
 0x360   :  { %s1052_s0 = smul.f32 0.125, %s1411_s26 }
 0x362   :  { %v1053_v54 = vstv %s1052_s0 }
 0x395   :  { %v1065_v52 = vpop.permute.xlu0 %1064 }
 0x399   :  { %v874_v26 = vpop.xlane.xlu2 %873 }
 0x39a   :  { %v875_v27 = vadd.f32 1e-12, %v874_v26 }
 0x39c   :  { %1449 = vrsqrt.f32 %v875_v27  ;;  %vm882_vm6 = vweird.f32 %v875_v27 }
 0x3a1   :  { %v1061_v50 = vpop.permute.xlu2 %1060 }
 0x3a2   :  { %v1450_v28 = vpop.eup %1449 }
 0x3a3   :  { %v877_v29 = vmul.f32 %v1450_v28, %v875_v27  ;;  %vm883_vm5 = vweird.f32 %v1450_v28 }
 0x3a4   :  { %vm884_vm7 = vmor %vm882_vm6, %vm883_vm5 }
 0x3a5   :  { %v878_v30 = vmul.f32 %v1450_v28, %v877_v29 }
 0x3a7   :  { %v879_v31 = vmul.f32 0.5, %v878_v30 }
 0x3a9   :  { %v880_v32 = vsub.f32 1.5, %v879_v31 }
 0x3ab   :  { %v881_v35 = vmul.f32 %v1450_v28, %v880_v32 }
 0x3ad   :  { %v885_v38 = vsel %vm884_vm7, %v1450_v28, %v881_v35 }
 0x3ae   :  { %v886_v39 = vmul.f32 %v885_v38, %v870_v17 }
 0x3b0   :  { %v887_v44 = vpack.c.bf16 %v886_v39, %v886_v39 }
 0x3b2   :  { %v889_v45 = vsel %vm859_vm3, %v887_v44, 0 }
 0x3b3   :  { %898 = vmatpush.bf16.xpose.msra.mxu2 %v889_v45 }
 0x3ba   :  { %1339 = vmatmul.msk.bf16.vlgmr.msra.gmra.mxu2 %vm859_vm3, %v887_v44 }
 0x43d   :  { %v900_v43 = vpop.f32.mrf.mxu2 }
 0x43e   :  { %vm904_vm8 = vcmp.gt.f32.partialorder %v900_v43, 0.9 }
 0x43f   :  { %v905_v47 = vsel %vm904_vm8, 1.0, %v1455_v46 }
 0x440   :  { %1056 = vrot.lane.b32.xlu1 %v905_v47, %s1456_s25 }
 0x445   :  { %v902_v48 = vpop.f32.mrf.mxu2 }
 0x4b2   :  { %v1057_v49 = vpop.permute.xlu1 %1056 }
 0x4b3   :  { %v1068_v51 = vsel %vm1067_vm9, %v900_v43, %v1057_v49 }
 0x4b4   :  { %v1069_v53 = vsel %vm966_vm2, %v1068_v51, %v1061_v50 }
 0x4b5   :  { %v1071_v55 = vsel %vm1070_vm10, %v1069_v53, %v1065_v52 }
 0x4b6   :  { %v1073_v56 = vsel %vm1072_vm11, %v1071_v55, %v1053_v54 }
 0x4b7   :  { %v1075_v57 = vsel %vm1074_vm12, %v1073_v56, 0.0 }
 0x4b8   :  { %1076 = vst [vmem:[%s2107_s9] sm:$0xff] %v1075_v57 }

</bundles_post_ra>
